<compile_context>
chip_gen: v7x
topology: tpu7x:2x2x1
jax: 0.10.0
libtpu: 0.0.40
codegen_flags: <defaults>
</compile_context>

<pallas_src>
import jax
import jax.numpy as jnp
from jax.experimental import pallas as pl
from jax.experimental.pallas import tpu as pltpu


def mlp_kernel(x_ref, w1_ref, b1_ref, w2_ref, b2_ref, w3_ref, b3_ref, o_ref):
    # relu(relu(x W1 + b1) W2 + b2) W3 + b3, f32 accumulation on the MXU.
    x = x_ref[...].astype(w1_ref.dtype)
    h1 = jnp.dot(x, w1_ref[...], preferred_element_type=jnp.float32) + b1_ref[...]
    h1 = jnp.maximum(h1, 0.0)
    h2 = (jnp.dot(h1.astype(w2_ref.dtype), w2_ref[...],
                  preferred_element_type=jnp.float32) + b2_ref[...])
    h2 = jnp.maximum(h2, 0.0)
    out = (jnp.dot(h2.astype(w3_ref.dtype), w3_ref[...],
                   preferred_element_type=jnp.float32) + b3_ref[...])
    o_ref[...] = out.astype(o_ref.dtype)


def dqn_mlp(x, w1, b1, w2, b2, w3, b3, *, block_m=256):
    batch, obs_dim = x.shape
    hidden = w1.shape[1]
    n_actions = w3.shape[1]

    # --- lane-dense output: pad the action dim up to a multiple of 128 ---
    n_out = max(128, pl.cdiv(n_actions, 128) * 128)
    if n_out != n_actions:
        w3 = jnp.pad(w3, ((0, 0), (0, n_out - n_actions)))
        b3 = jnp.pad(b3, ((0, 0), (0, n_out - n_actions)))

    # --- batch tiling: TM rows per grid step (multiple of 8 sublanes) ---
    tm = min(block_m, pl.cdiv(batch, 8) * 8)
    padded_batch = pl.cdiv(batch, tm) * tm
    if padded_batch != batch:
        x = jnp.pad(x, ((0, padded_batch - batch), (0, 0)))
    grid = (padded_batch // tm,)

    # Weights / biases: constant block index -> VMEM-resident across all grid steps.
    resident = lambda shape: pl.BlockSpec(shape, lambda i: (0, 0))

    flops = 2 * padded_batch * (obs_dim * hidden + hidden * hidden + hidden * n_out)
    bytes_accessed = int(
        x.size * x.dtype.itemsize
        + sum(a.size * a.dtype.itemsize for a in (w1, b1, w2, b2, w3, b3))
        + padded_batch * n_out * 4
    )

    out = pl.pallas_call(
        mlp_kernel,
        out_shape=jax.ShapeDtypeStruct((padded_batch, n_out), jnp.float32),
        grid=grid,
        in_specs=[
            pl.BlockSpec((tm, obs_dim), lambda i: (i, 0)),
            resident(w1.shape), resident(b1.shape),
            resident(w2.shape), resident(b2.shape),
            resident(w3.shape), resident(b3.shape),
        ],
        out_specs=pl.BlockSpec((tm, n_out), lambda i: (i, 0)),
        compiler_params=pltpu.CompilerParams(
            dimension_semantics=("parallel",)),
        cost_estimate=pl.CostEstimate(
            flops=int(flops), transcendentals=0, bytes_accessed=bytes_accessed),
    )(x, w1, b1, w2, b2, w3, b3)

    # Strip batch padding and the lane padding on the action dim.
    return out[:batch, :n_actions]


def init_linear_params(key, in_features, out_features, *, weight_dtype=jnp.bfloat16):
    # Deterministic init mimicking PyTorch's default (uniform +/- 1/sqrt(in)).
    k_w, k_b = jax.random.split(key)
    bound = 1.0 / (in_features ** 0.5)
    # Stored already transposed: [in_features, out_features]; weights in bf16,
    # biases kept f32 (added after the f32 accumulation).
    w = jax.random.uniform(k_w, (in_features, out_features), jnp.float32, -bound, bound)
    b = jax.random.uniform(k_b, (1, out_features), jnp.float32, -bound, bound)
    return w.astype(weight_dtype), b


def reference_forward(x, w1, b1, w2, b2, w3, b3):
    # Pure f32 reference (weights upcast); kernel uses bf16 inputs to the MXU with
    # f32 accumulation, so comparison uses a bf16-level tolerance.
    f32 = jnp.float32
    h1 = jnp.maximum(x @ w1.astype(f32) + b1, 0.0)
    h2 = jnp.maximum(h1 @ w2.astype(f32) + b2, 0.0)
    return h2 @ w3.astype(f32) + b3


if __name__ == "__main__":
    # Small shapes consistent with a typical DQN env (e.g. CartPole):
    # observation_space.shape[0] = 4, action_space.n = 2.
    obs_dim, hidden, n_actions = 4, 128, 2

    key = jax.random.PRNGKey(0)
    k_x, k_x2, k1, k2, k3 = jax.random.split(key, 5)

    w1, b1 = init_linear_params(k1, obs_dim, hidden)
    w2, b2 = init_linear_params(k2, hidden, hidden)
    w3, b3 = init_linear_params(k3, hidden, n_actions)

    # 1) act()-sized batch: single grid step.
    batch = 8
    x = jax.random.normal(k_x, (batch, obs_dim), jnp.float32)
    out = jax.block_until_ready(dqn_mlp(x, w1, b1, w2, b2, w3, b3))
    ref = reference_forward(x, w1, b1, w2, b2, w3, b3)
    assert out.shape == (batch, n_actions)
    assert jnp.allclose(out, ref, atol=2e-2, rtol=2e-2)

    # 2) training-sized batch, not a multiple of the tile: exercises the
    #    multi-step parallel grid + batch padding path.
    batch2 = 200
    x2 = jax.random.normal(k_x2, (batch2, obs_dim), jnp.float32)
    out2 = jax.block_until_ready(dqn_mlp(x2, w1, b1, w2, b2, w3, b3, block_m=64))
    ref2 = reference_forward(x2, w1, b1, w2, b2, w3, b3)
    assert out2.shape == (batch2, n_actions)
    assert jnp.allclose(out2, ref2, atol=2e-2, rtol=2e-2)

    print("KERNEL_OK")
</pallas_src>

<mosaic_0001>
module attributes {stable_mosaic.version = 11 : i64} {
  func.func @mlp_kernel(%arg0: i32, %arg1: memref<8x4xf32, #tpu.memory_space<vmem>>, %arg2: memref<4x128xbf16, #tpu.memory_space<vmem>>, %arg3: memref<1x128xf32, #tpu.memory_space<vmem>>, %arg4: memref<128x128xbf16, #tpu.memory_space<vmem>>, %arg5: memref<1x128xf32, #tpu.memory_space<vmem>>, %arg6: memref<128x128xbf16, #tpu.memory_space<vmem>>, %arg7: memref<1x128xf32, #tpu.memory_space<vmem>>, %arg8: memref<8x128xf32, #tpu.memory_space<vmem>>) attributes {dimension_semantics = [#tpu.dimension_semantics<parallel>], iteration_bounds = array<i64: 1>, scalar_prefetch = 0 : i64, scratch_operands = 0 : i64, tpu.core_type = #tpu.core_type<tc>, window_params = [{transform_indices = @transform_0, window_bounds = array<i64: 8, 4>}, {pipeline_mode = #tpu.pipeline_mode<synchronous>, transform_indices = @transform_1, window_bounds = array<i64: 4, 128>}, {pipeline_mode = #tpu.pipeline_mode<synchronous>, transform_indices = @transform_2, window_bounds = array<i64: 1, 128>}, {pipeline_mode = #tpu.pipeline_mode<synchronous>, transform_indices = @transform_3, window_bounds = array<i64: 128, 128>}, {pipeline_mode = #tpu.pipeline_mode<synchronous>, transform_indices = @transform_4, window_bounds = array<i64: 1, 128>}, {pipeline_mode = #tpu.pipeline_mode<synchronous>, transform_indices = @transform_5, window_bounds = array<i64: 128, 128>}, {pipeline_mode = #tpu.pipeline_mode<synchronous>, transform_indices = @transform_6, window_bounds = array<i64: 1, 128>}, {transform_indices = @transform_7, window_bounds = array<i64: 8, 128>}]} {
    %c0 = arith.constant 0 : index
    %c0_0 = arith.constant 0 : index
    %0 = vector.load %arg1[%c0, %c0_0] : memref<8x4xf32, #tpu.memory_space<vmem>>, vector<8x4xf32>
    %1 = arith.truncf %0 : vector<8x4xf32> to vector<8x4xbf16>
    %c0_1 = arith.constant 0 : index
    %c0_2 = arith.constant 0 : index
    %2 = vector.load %arg2[%c0_1, %c0_2] : memref<4x128xbf16, #tpu.memory_space<vmem>>, vector<4x128xbf16>
    %cst = arith.constant dense<0.000000e+00> : vector<8x128xf32>
    %3 = tpu.matmul %1, %2, %cst {dimension_numbers = #tpu.dot_dimension_numbers<[1], [0], [0], [1], [0, 0, 1, 1], [], []>} : vector<8x4xbf16>, vector<4x128xbf16>, vector<8x128xf32> -> vector<8x128xf32>
    %c0_3 = arith.constant 0 : index
    %c0_4 = arith.constant 0 : index
    %4 = vector.load %arg3[%c0_3, %c0_4] : memref<1x128xf32, #tpu.memory_space<vmem>>, vector<1x128xf32>
    %5 = vector.broadcast %4 : vector<1x128xf32> to vector<8x128xf32>
    %6 = arith.addf %3, %5 : vector<8x128xf32>
    %cst_5 = arith.constant 0.000000e+00 : f32
    %7 = vector.broadcast %cst_5 : f32 to vector<8x128xf32>
    %8 = arith.maximumf %6, %7 : vector<8x128xf32>
    %9 = arith.truncf %8 : vector<8x128xf32> to vector<8x128xbf16>
    %c0_6 = arith.constant 0 : index
    %c0_7 = arith.constant 0 : index
    %10 = vector.load %arg4[%c0_6, %c0_7] : memref<128x128xbf16, #tpu.memory_space<vmem>>, vector<128x128xbf16>
    %cst_8 = arith.constant dense<0.000000e+00> : vector<8x128xf32>
    %11 = tpu.matmul %9, %10, %cst_8 {dimension_numbers = #tpu.dot_dimension_numbers<[1], [0], [0], [1], [0, 0, 1, 1], [], []>} : vector<8x128xbf16>, vector<128x128xbf16>, vector<8x128xf32> -> vector<8x128xf32>
    %c0_9 = arith.constant 0 : index
    %c0_10 = arith.constant 0 : index
    %12 = vector.load %arg5[%c0_9, %c0_10] : memref<1x128xf32, #tpu.memory_space<vmem>>, vector<1x128xf32>
    %13 = vector.broadcast %12 : vector<1x128xf32> to vector<8x128xf32>
    %14 = arith.addf %11, %13 : vector<8x128xf32>
    %cst_11 = arith.constant 0.000000e+00 : f32
    %15 = vector.broadcast %cst_11 : f32 to vector<8x128xf32>
    %16 = arith.maximumf %14, %15 : vector<8x128xf32>
    %17 = arith.truncf %16 : vector<8x128xf32> to vector<8x128xbf16>
    %c0_12 = arith.constant 0 : index
    %c0_13 = arith.constant 0 : index
    %18 = vector.load %arg6[%c0_12, %c0_13] : memref<128x128xbf16, #tpu.memory_space<vmem>>, vector<128x128xbf16>
    %cst_14 = arith.constant dense<0.000000e+00> : vector<8x128xf32>
    %19 = tpu.matmul %17, %18, %cst_14 {dimension_numbers = #tpu.dot_dimension_numbers<[1], [0], [0], [1], [0, 0, 1, 1], [], []>} : vector<8x128xbf16>, vector<128x128xbf16>, vector<8x128xf32> -> vector<8x128xf32>
    %c0_15 = arith.constant 0 : index
    %c0_16 = arith.constant 0 : index
    %20 = vector.load %arg7[%c0_15, %c0_16] : memref<1x128xf32, #tpu.memory_space<vmem>>, vector<1x128xf32>
    %21 = vector.broadcast %20 : vector<1x128xf32> to vector<8x128xf32>
    %22 = arith.addf %19, %21 : vector<8x128xf32>
    %c0_17 = arith.constant 0 : index
    %c0_18 = arith.constant 0 : index
    %23 = vector.load %arg8[%c0_17, %c0_18] : memref<8x128xf32, #tpu.memory_space<vmem>>, vector<8x128xf32>
    tpu.vector_store %arg8[%c0_17, %c0_18], %22 {strides = array<i32>} : memref<8x128xf32, #tpu.memory_space<vmem>>, vector<8x128xf32>,
    return
  }
  func.func @transform_0(%arg0: i32) -> (i32, i32) {
    %c0_i32 = arith.constant 0 : i32
    %c0_i32_0 = arith.constant 0 : i32
    return %arg0, %c0_i32 : i32, i32
  }
  func.func @transform_1(%arg0: i32) -> (i32, i32) {
    %c0_i32 = arith.constant 0 : i32
    %c0_i32_0 = arith.constant 0 : i32
    %c0_i32_1 = arith.constant 0 : i32
    return %c0_i32, %c0_i32_0 : i32, i32
  }
  func.func @transform_2(%arg0: i32) -> (i32, i32) {
    %c0_i32 = arith.constant 0 : i32
    %c0_i32_0 = arith.constant 0 : i32
    %c0_i32_1 = arith.constant 0 : i32
    return %c0_i32, %c0_i32_0 : i32, i32
  }
  func.func @transform_3(%arg0: i32) -> (i32, i32) {
    %c0_i32 = arith.constant 0 : i32
    %c0_i32_0 = arith.constant 0 : i32
    %c0_i32_1 = arith.constant 0 : i32
    return %c0_i32, %c0_i32_0 : i32, i32
  }
  func.func @transform_4(%arg0: i32) -> (i32, i32) {
    %c0_i32 = arith.constant 0 : i32
    %c0_i32_0 = arith.constant 0 : i32
    %c0_i32_1 = arith.constant 0 : i32
    return %c0_i32, %c0_i32_0 : i32, i32
  }
  func.func @transform_5(%arg0: i32) -> (i32, i32) {
    %c0_i32 = arith.constant 0 : i32
    %c0_i32_0 = arith.constant 0 : i32
    %c0_i32_1 = arith.constant 0 : i32
    return %c0_i32, %c0_i32_0 : i32, i32
  }
  func.func @transform_6(%arg0: i32) -> (i32, i32) {
    %c0_i32 = arith.constant 0 : i32
    %c0_i32_0 = arith.constant 0 : i32
    %c0_i32_1 = arith.constant 0 : i32
    return %c0_i32, %c0_i32_0 : i32, i32
  }
  func.func @transform_7(%arg0: i32) -> (i32, i32) {
    %c0_i32 = arith.constant 0 : i32
    %c0_i32_0 = arith.constant 0 : i32
    return %arg0, %c0_i32 : i32, i32
  }
}

</mosaic_0001>

<bundles_post_ra>
// kernel: tpu_custom_call.1
= control target key start
LH: loop header
LB: loop body
LE: loop exit
PB: predicated region body
PF: predicated region fallthrough
CT: control target
= control target key end

     0   :  { %12 = vsyncpa [#allocation3], 0  ;;  %s659_s0 = inlined_call_operand.vmem [shape: f32[8,4], index: 0, kind: input, shape index: {}]   ;;  %s660_s1 = inlined_call_operand.vmem [shape: bf16[4,128], index: 1, kind: input, shape index: {}]   ;;  %s661_s2 = inlined_call_operand.vmem [shape: f32[1,128], index: 2, kind: input, shape index: {}]   ;;  %s662_s3 = inlined_call_operand.hbm [shape: bf16[128,128], index: 3, kind: input, shape index: {}]   ;;  %s663_s4 = inlined_call_operand.vmem [shape: f32[1,128], index: 4, kind: input, shape index: {}]   ;;  %s664_s5 = inlined_call_operand.hbm [shape: bf16[128,128], index: 5, kind: input, shape index: {}]   ;;  %s665_s6 = inlined_call_operand.vmem [shape: f32[1,128], index: 6, kind: input, shape index: {}]   ;;  %s666_s7 = inlined_call_operand.hbm [shape: f32[8,128], index: 7, kind: output, shape index: {}]  }
   0x1   :  { %13 = vsyncpa [#allocation6], 0 }
   0x2   :  { %14 = vsyncpa [#allocation4], 0  ;;  %s538_s24 = smov [#allocation2]   ;;  %s466_s28 = scalar_lea.hbm %s662_s3, 1024 }
   0x3   :  { %s26_s25 = sshll.u32 %s538_s24, 4  ;;  %p467_p0 = scmp.ne.s32.totalorder %s662_s3, %s466_s28  ;;  %s27_s25 = int_to_ptr.vmem [resolvable:$true] %s26_s25 }
   0x4   :  { %p470_p1 = scmp.lt.u32.totalorder %s466_s28, %s662_s3 }
   0x6   :  { %p472_p2 = pnand %p470_p1, %p467_p0 }
   0x8   :  { %475 = shalt.err (!%p472_p2)
}
   0x9   :  { %s476_s10 = scalar_lea.vmem %s27_s25, 1024  ;;  %p481_p4 = scmp.lt.s32.totalorder %s27_s25, %s27_s25 }
   0xa   :  { %p477_p3 = scmp.ne.s32.totalorder %s27_s25, %s476_s10  ;;  %p482_p5 = scmp.lt.s32.totalorder %s476_s10, %s476_s10 }
   0xc   :  { %p483_p6 = por %p482_p5, %p481_p4 }
   0xe   :  { %p484_p7 = pnand %p483_p6, %p477_p3 }
  0x10   :  { %487 = shalt.err (!%p484_p7)
}
  0x11   :  { %s539_s11 = smov 64   ;;  %s540_s12 = smov 4  }
  0x12   :  { %32 = dma.hbm_to_vmem [thread:$0]  %s662_s3, 1024, %s27_s25, [#allocation3], %s539_s11, %s539_s11, %s540_s12  }
  0x13   :  { %s541_s15 = smov [#allocation5]   ;;  %s488_s19 = scalar_lea.hbm %s664_s5, 1024 }
  0x14   :  { %s40_s16 = sshll.u32 %s541_s15, 4  ;;  %p489_p8 = scmp.ne.s32.totalorder %s664_s5, %s488_s19  ;;  %s41_s16 = int_to_ptr.vmem [resolvable:$true] %s40_s16 }
  0x15   :  { %p492_p9 = scmp.lt.u32.totalorder %s488_s19, %s664_s5 }
  0x17   :  { %p494_p10 = pnand %p492_p9, %p489_p8 }
  0x19   :  { %497 = shalt.err (!%p494_p10)
}
  0x1a   :  { %s498_s24 = scalar_lea.vmem %s41_s16, 1024  ;;  %p503_p12 = scmp.lt.s32.totalorder %s41_s16, %s41_s16 }
  0x1b   :  { %p499_p11 = scmp.ne.s32.totalorder %s41_s16, %s498_s24  ;;  %p504_p13 = scmp.lt.s32.totalorder %s498_s24, %s498_s24 }
  0x1d   :  { %p505_p0 = por %p504_p13, %p503_p12 }
  0x1f   :  { %p506_p1 = pnand %p505_p0, %p499_p11 }
  0x21   :  { %509 = shalt.err (!%p506_p1)
}
  0x22   :  { %46 = dma.hbm_to_vmem [thread:$0]  %s664_s5, 1024, %s41_s16, [#allocation6], %s539_s11, %s539_s11, %s540_s12  }
  0x23   :  { %532 = dma.done.wait [#allocation3], 1024  }
  0x24   :  { %533 = vsyncadd [#allocation3], 4294966272 }
  0x25   :  { %534 = dma.done.wait [#allocation6], 1024  }
  0x26   :  { %535 = vsyncadd [#allocation6], 4294966272  ;;  %v542_v0 = vmov 0.0   ;;  %vm543_vm0 = vmmov 0   ;;  %vm70_vm1 = vcmask 1041408   ;;  %v56_v2 = vld [vmem:[%s659_s0] sm:$0xff] }
  0x27   :  { %397 = vmatprep.subr.bf16.mxu0 %v542_v0  ;;  %399 = vmatprep.mubr.msk.bf16.mxu0 %vm543_vm0, %v542_v0  ;;  %v58_v1 = vld [vmem:[%s660_s1] sm:$0x3]  ;;  %v57_v4 = vpack.c.bf16 %v56_v2, %v56_v2  ;;  %vm66_vm2 = vcmask 31744   ;;  %v451_v6 = vld [vmem:[#allocation2 + $0x8] sm:$0xff]   ;;  %v452_v7 = vld [vmem:[#allocation2 + $0x10] sm:$0xff]   ;;  %s544_s9 = smov [#allocation7]  }
  0x28   :  { %403 = vmatprep.subr.bf16.mxu1 %v542_v0  ;;  %419 = vmatprep.mubr.msk.bf16.mxu1 %vm543_vm0, %v542_v0  ;;  %v72_v3 = vsel %vm70_vm1, %v58_v1, 0  ;;  %v450_v5 = vld [vmem:[#allocation2] sm:$0xff]   ;;  %v453_v8 = vld [vmem:[#allocation2 + $0x18] sm:$0xff]   ;;  %v455_v10 = vld [vmem:[#allocation2 + $0x28] sm:$0xff]   ;;  %s347_s10 = sshll.u32 %s544_s9, 4  ;;  %s348_s10 = int_to_ptr.vmem [resolvable:$true] %s347_s10 }
  0x29   :  { %398 = vmatpush3.bf16.msra.mxu0 %v72_v3  ;;  %404 = vmatpush3.bf16.msra.mxu1 %v450_v5  ;;  %v454_v9 = vld [vmem:[#allocation2 + $0x20] sm:$0xff]   ;;  %v456_v11 = vld [vmem:[#allocation2 + $0x30] sm:$0xff]   ;;  %v457_v12 = vld [vmem:[#allocation2 + $0x38] sm:$0xff]   ;;  %p515_p3 = scmp.lt.s32.totalorder %s348_s10, %s348_s10 }
  0x2a   :  { %423 = vmatprep.subr.bf16.mxu0 %v542_v0  ;;  %405 = vmatprep.subr.bf16.mxu1 %v542_v0  ;;  %v458_v13 = vld [vmem:[#allocation5] sm:$0xff]   ;;  %v459_v14 = vld [vmem:[#allocation5 + $0x8] sm:$0xff]   ;;  %v460_v15 = vld [vmem:[#allocation5 + $0x10] sm:$0xff]  }
  0x2b   :  { %v461_v16 = vld [vmem:[#allocation5 + $0x18] sm:$0xff]   ;;  %v462_v17 = vld [vmem:[#allocation5 + $0x20] sm:$0xff]   ;;  %v463_v18 = vld [vmem:[#allocation5 + $0x28] sm:$0xff]  }
  0x2c   :  { %400 = vmatmul.mubr.msk.bf16.vlgmr.msra.gmra.mrb[0].mxu0 %vm66_vm2, %v57_v4  ;;  %v357_v19 = vld [vmem:[%s661_s2] ss:$0 sm:$0xff]  ;;  %v464_v27 = vld [vmem:[#allocation5 + $0x30] sm:$0xff]   ;;  %v465_v28 = vld [vmem:[#allocation5 + $0x38] sm:$0xff]  }
  0x2d   :  { %439 = vmatprep.mubr.msk.bf16.mxu0 %vm543_vm0, %v542_v0  ;;  %406 = vmatpush3.bf16.msra.mxu1 %v451_v6  ;;  %v359_v29 = vld [vmem:[%s663_s4] ss:$0 sm:$0xff]  ;;  %s510_s4 = scalar_lea.vmem %s348_s10, 128 }
  0x2e   :  { %407 = vmatprep.subr.bf16.mxu1 %v542_v0  ;;  %424 = vmatpush3.bf16.msra.mxu0 %v458_v13  ;;  %v368_v37 = vld [vmem:[%s665_s6] ss:$0 sm:$0xff]  ;;  %p511_p2 = scmp.ne.s32.totalorder %s348_s10, %s510_s4  ;;  %p516_p4 = scmp.lt.s32.totalorder %s510_s4, %s510_s4 }
  0x2f   :  { %425 = vmatprep.subr.bf16.mxu0 %v542_v0 }
  0x30   :  { %p517_p5 = por %p516_p4, %p515_p3 }
  0x31   :  { %408 = vmatpush3.bf16.msra.mxu1 %v452_v7 }
  0x32   :  { %409 = vmatprep.subr.bf16.mxu1 %v542_v0  ;;  %426 = vmatpush3.bf16.msra.mxu0 %v459_v14  ;;  %p518_p6 = pnand %p517_p5, %p511_p2 }
  0x33   :  { %427 = vmatprep.subr.bf16.mxu0 %v542_v0 }
  0x35   :  { %410 = vmatpush3.bf16.msra.mxu1 %v453_v8 }
  0x36   :  { %411 = vmatprep.subr.bf16.mxu1 %v542_v0  ;;  %428 = vmatpush3.bf16.msra.mxu0 %v460_v15 }
  0x37   :  { %429 = vmatprep.subr.bf16.mxu0 %v542_v0 }
  0x39   :  { %412 = vmatpush3.bf16.msra.mxu1 %v454_v9 }
  0x3a   :  { %413 = vmatprep.subr.bf16.mxu1 %v542_v0  ;;  %430 = vmatpush3.bf16.msra.mxu0 %v461_v16 }
  0x3b   :  { %431 = vmatprep.subr.bf16.mxu0 %v542_v0 }
  0x3d   :  { %414 = vmatpush3.bf16.msra.mxu1 %v455_v10 }
  0x3e   :  { %415 = vmatprep.subr.bf16.mxu1 %v542_v0  ;;  %432 = vmatpush3.bf16.msra.mxu0 %v462_v17 }
  0x3f   :  { %433 = vmatprep.subr.bf16.mxu0 %v542_v0 }
  0x41   :  { %416 = vmatpush3.bf16.msra.mxu1 %v456_v11 }
  0x42   :  { %417 = vmatprep.subr.bf16.mxu1 %v542_v0  ;;  %434 = vmatpush3.bf16.msra.mxu0 %v463_v18 }
  0x43   :  { %435 = vmatprep.subr.bf16.mxu0 %v542_v0 }
  0x45   :  { %418 = vmatpush3.bf16.msra.mxu1 %v457_v12 }
  0x46   :  { %436 = vmatpush3.bf16.msra.mxu0 %v464_v27 }
  0x47   :  { %437 = vmatprep.subr.bf16.mxu0 %v542_v0 }
  0x4a   :  { %438 = vmatpush3.bf16.msra.mxu0 %v465_v28 }
  0xff   :  { %v108_v20 = vpop.f32.mrb[0].mxu0 }
 0x100   :  { %v109_v21 = vadd.f32 %v357_v19, %v108_v20  ;;  %v401_v22 = vpop.f32.mrb[1].mxu0 }
 0x101   :  { %v111_v23 = vpop.f32.mrb[2].mxu0 }
 0x102   :  { %v114_v24 = vmax.f32 %v109_v21, 0.0  ;;  %v402_v25 = vpop.f32.mrb[3].mxu0 }
 0x104   :  { %v115_v26 = vpack.c.bf16 %v114_v24, %v114_v24 }
 0x106   :  { %420 = vmatmul.mubr.bf16.vlgmr.msra.gmra.mrb[0].mxu1 %v115_v26 }
 0x1d9   :  { %v221_v30 = vpop.f32.mrb[0].mxu1 }
 0x1da   :  { %v222_v31 = vadd.f32 %v359_v29, %v221_v30  ;;  %v421_v32 = vpop.f32.mrb[1].mxu1 }
 0x1db   :  { %v224_v33 = vpop.f32.mrb[2].mxu1 }
 0x1dc   :  { %v227_v34 = vmax.f32 %v222_v31, 0.0  ;;  %v422_v35 = vpop.f32.mrb[3].mxu1 }
 0x1de   :  { %v228_v36 = vpack.c.bf16 %v227_v34, %v227_v34 }
 0x1e0   :  { %440 = vmatmul.mubr.bf16.vlgmr.msra.gmra.mrb[4].mxu0 %v228_v36 }
 0x2b3   :  { %v334_v38 = vpop.f32.mrb[4].mxu0 }
 0x2b4   :  { %v335_v39 = vadd.f32 %v368_v37, %v334_v38  ;;  %v441_v40 = vpop.f32.mrb[5].mxu0 }
 0x2b5   :  { %v337_v41 = vpop.f32.mrb[6].mxu0 }
 0x2b6   :  { %340 = vst [vmem:[#allocation7] sm:$0xff] %v335_v39  ;;  %v442_v42 = vpop.f32.mrb[7].mxu0 }
 0x2b7   :  { %521 = shalt.err (!%p518_p6)
}
 0x2b8   :  { %s522_s6 = scalar_lea.hbm %s666_s7, 128 }
 0x2b9   :  { %p523_p7 = scmp.ne.s32.totalorder %s666_s7, %s522_s6  ;;  %p526_p8 = scmp.lt.u32.totalorder %s522_s6, %s666_s7 }
 0x2bb   :  { %p528_p9 = pnand %p526_p8, %p523_p7 }
 0x2bd   :  { %531 = shalt.err (!%p528_p9)
}
 0x2be   :  { %350 = dma.vmem_to_hbm [thread:$0]  %s348_s10, 128, %s666_s7, [#allocation4]  }
 0x2bf   :  { %536 = dma.done.wait [#allocation4], 128  }
 0x2c0   :  { %537 = vsyncadd [#allocation4], 4294967168 }
 0x2c1   :  { %354 = vsyncpa [#allocation3], 1 }
 0x2c2   :  { %355 = vsyncpa [#allocation6], 1 }
 0x2c3   :  { %356 = vsyncpa [#allocation4], 1 }

</bundles_post_ra>
